<compile_context>
chip_gen: v5e
topology: v5e:2x2
jax: 0.10.0
libtpu: 0.0.40
codegen_flags: <defaults>
</compile_context>

<pallas_src>
import functools

import jax
import jax.numpy as jnp
import numpy as np
from jax.experimental import pallas as pl
from jax.experimental.pallas import tpu as pltpu

Q_MAX_16 = 2 ** 15 - 1
Q_MIN_16 = -2 ** 15
Q_MAX_8 = 2 ** 7 - 1
Q_MIN_8 = -2 ** 7

_LANE = 128
_CS_FACTOR = 2.0 / (Q_MAX_16 - Q_MIN_16)
_CS_FLOOR = 2.0 ** -100      # clamp: all-zero feature map must not give NaNs


def _round_up(x, m):
    return ((x + m - 1) // m) * m


# -----------------------------------------------------------------------------
# wrapper-side layout prep (cheap XLA glue, no data amplification)
# -----------------------------------------------------------------------------
def _prepare(x_nchw, weight, stride, padding):
    """Phase-decomposed, zero-padded, flattened input + folded tap weights.

    Conv tap (i, j) of a stride-s convolution reads phase (i % s, j % s) of the
    padded input at flat offset (i // s) * Ws + (j // s).  Stacking the KH*KW
    shifted (Cin, Mw) slices gives one (KH*KW*Cin, Mw) operand, so the whole
    conv is a single MXU matmul against the (P, KH*KW*Cin) folded weight.
    "Wide" output columns (x >= OW) are garbage and are masked to zero
    in-kernel.  For stride == 1 this prep is just pad + flatten.
    """
    n, cin, h, w = x_nchw.shape
    p, _, kh, kw = weight.shape
    s = stride
    hp, wp = h + 2 * padding, w + 2 * padding
    oh = (hp - kh) // s + 1
    ow = (wp - kw) // s + 1
    hs = -(-hp // s)                          # ceil(hp / s)
    ws = -(-wp // s)                          # ceil(wp / s)
    mw = _round_up(oh * ws, _LANE)            # lane-dense wide output length

    taps = tuple(((i % s) * s + (j % s), (i // s) * ws + (j // s))
                 for i in range(kh) for j in range(kw))
    ls = max(hs * ws, max(off for _, off in taps) + mw)

    xp = jnp.pad(x_nchw.astype(jnp.float32),
                 ((0, 0), (0, 0), (padding, padding), (padding, padding)))
    phases = []
    for a in range(s):
        for b in range(s):
            ph = xp[:, :, a::s, b::s]
            ph = jnp.pad(ph, ((0, 0), (0, 0),
                              (0, hs - ph.shape[2]), (0, ws - ph.shape[3])))
            phases.append(ph)
    xph = jnp.stack(phases, axis=1)                        # (N, s*s, Cin, Hs, Ws)
    xflat = xph.reshape(n, s * s, cin, hs * ws)
    xflat = jnp.pad(xflat, ((0, 0), (0, 0), (0, 0), (0, ls - hs * ws)))

    # folded weight: column (t*Cin + c)  <->  weight[:, c, i_t, j_t]
    w_flat = jnp.transpose(weight.astype(jnp.float32),
                           (0, 2, 3, 1)).reshape(p, kh * kw * cin)

    idx = jnp.arange(mw)
    mask = ((idx < oh * ws) & (idx % ws < ow)).astype(jnp.float32).reshape(1, mw)

    dims = dict(oh=oh, ow=ow, ws=ws, mw=mw, taps=taps)
    return xflat, w_flat, mask, dims


# -----------------------------------------------------------------------------
# fused kernel: conv (single K=KH*KW*Cin matmul) + running max|c|
#               + pl.when finalize: pow-2 C_s, quant_16 -> +bias -> quant_8
# -----------------------------------------------------------------------------
def _fused_kernel(x_ref, w_ref, mask_ref, b_ref, o_ref,
                  xstk_ref, c_ref, mx_ref, *, taps, cin, mw, n):
    i = pl.program_id(0)

    @pl.when(i == 0)
    def _init():
        mx_ref[...] = jnp.zeros_like(mx_ref)

    # One-time staging copy: stack the KH*KW shifted (Cin, Mw) slices so the
    # conv becomes a single (P, K) x (K, Mw) MXU matmul with K = KH*KW*Cin.
    for t, (ph, off) in enumerate(taps):
        xstk_ref[t * cin:(t + 1) * cin, :] = x_ref[0, ph, :, pl.ds(off, mw)]

    c = jnp.dot(w_ref[...], xstk_ref[...], preferred_element_type=jnp.float32)
    c = c * mask_ref[...]                          # zero the wide-garbage cols
    c_ref[i] = c                                   # held in VMEM across samples

    m = jnp.max(jnp.abs(c), axis=1, keepdims=True)  # (P, 1)  lane reduce
    m = jnp.max(m, axis=0, keepdims=True)           # (1, 1)  sublane reduce
    mx_ref[...] = jnp.maximum(mx_ref[...], m)

    @pl.when(i == pl.num_programs(0) - 1)
    def _finalize():
        # SAVE_FM-style power-of-two calibration on a (1,1) vector value
        # (log2/ceil/exp2 stay on the EUP/VPU; no scalar transcendentals).
        cs = jnp.maximum(mx_ref[...] * _CS_FACTOR, _CS_FLOOR)
        cs = jnp.exp2(jnp.ceil(jnp.log2(cs)))        # C_s, exact power of two
        inv_cs = 1.0 / cs                            # exact reciprocal (pow-2)
        # X_s = 2^ceil(log2(1)) = 1 exactly -> quant_8 is just round + clip.
        for s in range(n):                           # n is small and static
            q16 = jnp.clip(jnp.round(c_ref[s] * inv_cs),
                           Q_MIN_16, Q_MAX_16) * cs
            y = q16 + b_ref[...]                     # (P, Mw) + (P, 1)
            o_ref[s] = jnp.clip(jnp.round(y), Q_MIN_8, Q_MAX_8)


@functools.partial(jax.jit, static_argnames=("stride", "padding"))
def basic_conv2d_quant(x_nchw, weight, bias, stride, padding):
    """x_nchw: (N, Cin, H, W); weight: (P, Cin, KH, KW); bias: (P,). Returns NCHW."""
    n = x_nchw.shape[0]
    p = weight.shape[0]
    xflat, w_flat, mask, d = _prepare(x_nchw, weight, stride, padding)
    s2, cin, ls = xflat.shape[1], xflat.shape[2], xflat.shape[3]
    nt = len(d["taps"])
    mw, oh, ow, ws = d["mw"], d["oh"], d["ow"], d["ws"]

    # 32 MiB is safe on every generation (v5e/v6e 128 MiB, v7x 64 MiB per TC);
    # the whole working set here is well under 1 MiB.
    cparams = pltpu.CompilerParams(dimension_semantics=("arbitrary",),
                                   vmem_limit_bytes=32 * 1024 * 1024)

    y_wide = pl.pallas_call(
        functools.partial(_fused_kernel, taps=d["taps"], cin=cin, mw=mw, n=n),
        out_shape=jax.ShapeDtypeStruct((n, p, mw), jnp.float32),
        grid=(n,),
        in_specs=[
            pl.BlockSpec((1, s2, cin, ls), lambda i: (i, 0, 0, 0)),  # one sample
            pl.BlockSpec((p, nt * cin), lambda i: (0, 0)),           # folded weight
            pl.BlockSpec((1, mw), lambda i: (0, 0)),                 # valid-col mask
            pl.BlockSpec((p, 1), lambda i: (0, 0)),                  # bias column
        ],
        out_specs=pl.BlockSpec((n, p, mw), lambda i: (0, 0, 0)),     # VMEM-resident
        scratch_shapes=[
            pltpu.VMEM((nt * cin, mw), jnp.float32),   # stacked-taps MXU operand
            pltpu.VMEM((n, p, mw), jnp.float32),       # c held across samples
            pltpu.VMEM((1, 1), jnp.float32),           # running max|c|
        ],
        compiler_params=cparams,
    )(xflat, w_flat, mask, bias.astype(jnp.float32).reshape(p, 1))

    # channel-major wide layout -> NCHW (one small XLA reslice; kept because the
    # module contract is NCHW -- downstream consumers could take y_wide as-is).
    return y_wide[:, :, :oh * ws].reshape(n, p, oh, ws)[:, :, :, :ow]


# -----------------------------------------------------------------------------
# references (pure JAX / numpy) used for verification
# -----------------------------------------------------------------------------
def _reference(x_nchw, weight, bias, stride, padding):
    """Pure-JAX forward using the identical folded-tap formulation (no Pallas)."""
    n = x_nchw.shape[0]
    p = weight.shape[0]
    xflat, w_flat, mask, d = _prepare(x_nchw, weight, stride, padding)
    mw, oh, ow, ws = d["mw"], d["oh"], d["ow"], d["ws"]
    per_sample = []
    for si in range(n):
        xstk = jnp.concatenate([xflat[si, ph, :, off:off + mw]
                                for ph, off in d["taps"]], axis=0)
        per_sample.append(
            jnp.dot(w_flat, xstk, preferred_element_type=jnp.float32) * mask)
    c = jnp.stack(per_sample)                                   # (N, P, Mw)
    c_s = jnp.maximum(jnp.max(jnp.abs(c)) * _CS_FACTOR, _CS_FLOOR)
    c_s = jnp.exp2(jnp.ceil(jnp.log2(c_s)))
    y = jnp.clip(jnp.round(c * (1.0 / c_s)), Q_MIN_16, Q_MAX_16) * c_s
    y = y + bias.astype(jnp.float32).reshape(1, p, 1)
    y = jnp.clip(jnp.round(y), Q_MIN_8, Q_MAX_8)                # X_s = 1
    return y[:, :, :oh * ws].reshape(n, p, oh, ws)[:, :, :, :ow]


def _np_direct_conv(x, w, stride, padding):
    """Direct float64 NCHW conv (independent of the wide-flat layout logic)."""
    x = np.asarray(x, np.float64)
    w = np.asarray(w, np.float64)
    n, cin, h, ww = x.shape
    p, _, kh, kw = w.shape
    xp = np.pad(x, ((0, 0), (0, 0), (padding, padding), (padding, padding)))
    oh = (h + 2 * padding - kh) // stride + 1
    ow = (ww + 2 * padding - kw) // stride + 1
    out = np.zeros((n, p, oh, ow), np.float64)
    for i in range(kh):
        for j in range(kw):
            patch = xp[:, :, i:i + stride * oh:stride, j:j + stride * ow:stride]
            out += np.einsum('pc,nchw->nphw', w[:, :, i, j], patch)
    return out


def _np_conv_from_prepared(xflat, w_flat, mask, d):
    """Float64 replay of the kernel's folded tap/offset/mask arithmetic."""
    xflat = np.asarray(xflat, np.float64)
    w_flat = np.asarray(w_flat, np.float64)
    mask = np.asarray(mask, np.float64)
    n = xflat.shape[0]
    p = w_flat.shape[0]
    mw, oh, ow, ws = d["mw"], d["oh"], d["ow"], d["ws"]
    c = np.zeros((n, p, mw), np.float64)
    for si in range(n):
        xstk = np.concatenate([xflat[si, ph, :, off:off + mw]
                               for ph, off in d["taps"]], axis=0)
        c[si] = w_flat @ xstk
    c *= mask
    return c[:, :, :oh * ws].reshape(n, p, oh, ws)[:, :, :, :ow]


if __name__ == "__main__":
    # Module config: BasicConv2d(inplanes=4, planes=8, kernel_size=3, stride=1, padding=1)
    inplanes, planes, ksize, stride, padding = 4, 8, 3, 1, 1
    N, H, W = 2, 16, 16

    key = jax.random.PRNGKey(0)
    kx, kw_, kb = jax.random.split(key, 3)
    x = jax.random.normal(kx, (N, inplanes, H, W), dtype=jnp.float32)
    # deterministic PyTorch-style init: U(-1/sqrt(fan_in), 1/sqrt(fan_in))
    fan_in = inplanes * ksize * ksize
    bound = 1.0 / np.sqrt(fan_in)
    weight = jax.random.uniform(kw_, (planes, inplanes, ksize, ksize),
                                minval=-bound, maxval=bound, dtype=jnp.float32)
    bias = jax.random.uniform(kb, (planes,), minval=-bound, maxval=bound,
                              dtype=jnp.float32)

    out = basic_conv2d_quant(x, weight, bias, stride, padding)
    out = jax.block_until_ready(out)

    # 1) float64 check of the wide-flat tap/offset/mask layout vs a direct conv
    xflat, w_flat, mask, d = _prepare(x, weight, stride, padding)
    np.testing.assert_allclose(
        _np_conv_from_prepared(xflat, w_flat, mask, d),
        _np_direct_conv(x, weight, stride, padding),
        rtol=1e-10, atol=1e-10)

    # 2) end-to-end check of the fused Pallas pipeline vs the pure-JAX reference
    ref = _reference(x, weight, bias, stride, padding)
    np.testing.assert_allclose(np.asarray(out), np.asarray(ref), rtol=1e-5, atol=1e-5)

    print("KERNEL_OK")
</pallas_src>

<mosaic_0001>
module attributes {stable_mosaic.version = 11 : i64} {
  func.func @_fused_kernel(%arg0: i32, %arg1: memref<1x1x4x422xf32, #tpu.memory_space<vmem>>, %arg2: memref<8x36xf32, #tpu.memory_space<vmem>>, %arg3: memref<1x384xf32, #tpu.memory_space<vmem>>, %arg4: memref<8x1xf32, #tpu.memory_space<vmem>>, %arg5: memref<2x8x384xf32, #tpu.memory_space<vmem>>, %arg6: memref<36x384xf32, #tpu.memory_space<vmem>>, %arg7: memref<2x8x384xf32, #tpu.memory_space<vmem>>, %arg8: memref<1x1xf32, #tpu.memory_space<vmem>>) attributes {dimension_semantics = [#tpu.dimension_semantics<arbitrary>], iteration_bounds = array<i64: 2>, scalar_prefetch = 0 : i64, scratch_operands = 3 : i64, tpu.core_type = #tpu.core_type<tc>, window_params = [{transform_indices = @transform_0, window_bounds = array<i64: 1, 1, 4, 422>}, {pipeline_mode = #tpu.pipeline_mode<synchronous>, transform_indices = @transform_1, window_bounds = array<i64: 8, 36>}, {pipeline_mode = #tpu.pipeline_mode<synchronous>, transform_indices = @transform_2, window_bounds = array<i64: 1, 384>}, {pipeline_mode = #tpu.pipeline_mode<synchronous>, transform_indices = @transform_3, window_bounds = array<i64: 8, 1>}, {pipeline_mode = #tpu.pipeline_mode<synchronous>, transform_indices = @transform_4, window_bounds = array<i64: 2, 8, 384>}]} {
    %c0_i32 = arith.constant 0 : i32
    %0 = arith.cmpi eq, %arg0, %c0_i32 : i32
    %1 = arith.extui %0 : i1 to i32
    %c0_i32_0 = arith.constant 0 : i32
    %2 = arith.cmpi ne, %1, %c0_i32_0 : i32
    scf.if %2 {
      %cst_54 = arith.constant 0.000000e+00 : f32
      %51 = vector.broadcast %cst_54 : f32 to vector<1x1xf32>
      %c0_55 = arith.constant 0 : index
      %c0_56 = arith.constant 0 : index
      %52 = vector.load %arg8[%c0_55, %c0_56] : memref<1x1xf32, #tpu.memory_space<vmem>>, vector<1x1xf32>
      tpu.vector_store %arg8[%c0_55, %c0_56], %51 {strides = array<i32>} : memref<1x1xf32, #tpu.memory_space<vmem>>, vector<1x1xf32>,
    } else {
    }
    %c0 = arith.constant 0 : index
    %c0_1 = arith.constant 0 : index
    %c0_2 = arith.constant 0 : index
    %c0_3 = arith.constant 0 : index
    %3 = vector.load %arg1[%c0, %c0_1, %c0_2, %c0_3] : memref<1x1x4x422xf32, #tpu.memory_space<vmem>>, vector<1x1x4x384xf32>
    %4 = vector.shape_cast %3 : vector<1x1x4x384xf32> to vector<4x384xf32>
    %c0_4 = arith.constant 0 : index
    %c0_5 = arith.constant 0 : index
    %5 = vector.load %arg6[%c0_4, %c0_5] : memref<36x384xf32, #tpu.memory_space<vmem>>, vector<4x384xf32>
    tpu.vector_store %arg6[%c0_4, %c0_5], %4 {strides = array<i32>} : memref<36x384xf32, #tpu.memory_space<vmem>>, vector<4x384xf32>,
    %c0_6 = arith.constant 0 : index
    %c0_7 = arith.constant 0 : index
    %c0_8 = arith.constant 0 : index
    %c1 = arith.constant 1 : index
    %6 = vector.load %arg1[%c0_6, %c0_7, %c0_8, %c1] : memref<1x1x4x422xf32, #tpu.memory_space<vmem>>, vector<1x1x4x384xf32>
    %7 = vector.shape_cast %6 : vector<1x1x4x384xf32> to vector<4x384xf32>
    %c4 = arith.constant 4 : index
    %c0_9 = arith.constant 0 : index
    %8 = vector.load %arg6[%c4, %c0_9] : memref<36x384xf32, #tpu.memory_space<vmem>>, vector<4x384xf32>
    tpu.vector_store %arg6[%c4, %c0_9], %7 {strides = array<i32>} : memref<36x384xf32, #tpu.memory_space<vmem>>, vector<4x384xf32>,
    %c0_10 = arith.constant 0 : index
    %c0_11 = arith.constant 0 : index
    %c0_12 = arith.constant 0 : index
    %c2 = arith.constant 2 : index
    %9 = vector.load %arg1[%c0_10, %c0_11, %c0_12, %c2] : memref<1x1x4x422xf32, #tpu.memory_space<vmem>>, vector<1x1x4x384xf32>
    %10 = vector.shape_cast %9 : vector<1x1x4x384xf32> to vector<4x384xf32>
    %c8 = arith.constant 8 : index
    %c0_13 = arith.constant 0 : index
    %11 = vector.load %arg6[%c8, %c0_13] : memref<36x384xf32, #tpu.memory_space<vmem>>, vector<4x384xf32>
    tpu.vector_store %arg6[%c8, %c0_13], %10 {strides = array<i32>} : memref<36x384xf32, #tpu.memory_space<vmem>>, vector<4x384xf32>,
    %c0_14 = arith.constant 0 : index
    %c0_15 = arith.constant 0 : index
    %c0_16 = arith.constant 0 : index
    %c18 = arith.constant 18 : index
    %12 = vector.load %arg1[%c0_14, %c0_15, %c0_16, %c18] : memref<1x1x4x422xf32, #tpu.memory_space<vmem>>, vector<1x1x4x384xf32>
    %13 = vector.shape_cast %12 : vector<1x1x4x384xf32> to vector<4x384xf32>
    %c12 = arith.constant 12 : index
    %c0_17 = arith.constant 0 : index
    %14 = vector.load %arg6[%c12, %c0_17] : memref<36x384xf32, #tpu.memory_space<vmem>>, vector<4x384xf32>
    tpu.vector_store %arg6[%c12, %c0_17], %13 {strides = array<i32>} : memref<36x384xf32, #tpu.memory_space<vmem>>, vector<4x384xf32>,
    %c0_18 = arith.constant 0 : index
    %c0_19 = arith.constant 0 : index
    %c0_20 = arith.constant 0 : index
    %c19 = arith.constant 19 : index
    %15 = vector.load %arg1[%c0_18, %c0_19, %c0_20, %c19] : memref<1x1x4x422xf32, #tpu.memory_space<vmem>>, vector<1x1x4x384xf32>
    %16 = vector.shape_cast %15 : vector<1x1x4x384xf32> to vector<4x384xf32>
    %c16 = arith.constant 16 : index
    %c0_21 = arith.constant 0 : index
    %17 = vector.load %arg6[%c16, %c0_21] : memref<36x384xf32, #tpu.memory_space<vmem>>, vector<4x384xf32>
    tpu.vector_store %arg6[%c16, %c0_21], %16 {strides = array<i32>} : memref<36x384xf32, #tpu.memory_space<vmem>>, vector<4x384xf32>,
    %c0_22 = arith.constant 0 : index
    %c0_23 = arith.constant 0 : index
    %c0_24 = arith.constant 0 : index
    %c20 = arith.constant 20 : index
    %18 = vector.load %arg1[%c0_22, %c0_23, %c0_24, %c20] : memref<1x1x4x422xf32, #tpu.memory_space<vmem>>, vector<1x1x4x384xf32>
    %19 = vector.shape_cast %18 : vector<1x1x4x384xf32> to vector<4x384xf32>
    %c20_25 = arith.constant 20 : index
    %c0_26 = arith.constant 0 : index
    %20 = vector.load %arg6[%c20_25, %c0_26] : memref<36x384xf32, #tpu.memory_space<vmem>>, vector<4x384xf32>
    tpu.vector_store %arg6[%c20_25, %c0_26], %19 {strides = array<i32>} : memref<36x384xf32, #tpu.memory_space<vmem>>, vector<4x384xf32>,
    %c0_27 = arith.constant 0 : index
    %c0_28 = arith.constant 0 : index
    %c0_29 = arith.constant 0 : index
    %c36 = arith.constant 36 : index
    %21 = vector.load %arg1[%c0_27, %c0_28, %c0_29, %c36] : memref<1x1x4x422xf32, #tpu.memory_space<vmem>>, vector<1x1x4x384xf32>
    %22 = vector.shape_cast %21 : vector<1x1x4x384xf32> to vector<4x384xf32>
    %c24 = arith.constant 24 : index
    %c0_30 = arith.constant 0 : index
    %23 = vector.load %arg6[%c24, %c0_30] : memref<36x384xf32, #tpu.memory_space<vmem>>, vector<4x384xf32>
    tpu.vector_store %arg6[%c24, %c0_30], %22 {strides = array<i32>} : memref<36x384xf32, #tpu.memory_space<vmem>>, vector<4x384xf32>,
    %c0_31 = arith.constant 0 : index
    %c0_32 = arith.constant 0 : index
    %c0_33 = arith.constant 0 : index
    %c37 = arith.constant 37 : index
    %24 = vector.load %arg1[%c0_31, %c0_32, %c0_33, %c37] : memref<1x1x4x422xf32, #tpu.memory_space<vmem>>, vector<1x1x4x384xf32>
    %25 = vector.shape_cast %24 : vector<1x1x4x384xf32> to vector<4x384xf32>
    %c28 = arith.constant 28 : index
    %c0_34 = arith.constant 0 : index
    %26 = vector.load %arg6[%c28, %c0_34] : memref<36x384xf32, #tpu.memory_space<vmem>>, vector<4x384xf32>
    tpu.vector_store %arg6[%c28, %c0_34], %25 {strides = array<i32>} : memref<36x384xf32, #tpu.memory_space<vmem>>, vector<4x384xf32>,
    %c0_35 = arith.constant 0 : index
    %c0_36 = arith.constant 0 : index
    %c0_37 = arith.constant 0 : index
    %c38 = arith.constant 38 : index
    %27 = vector.load %arg1[%c0_35, %c0_36, %c0_37, %c38] : memref<1x1x4x422xf32, #tpu.memory_space<vmem>>, vector<1x1x4x384xf32>
    %28 = vector.shape_cast %27 : vector<1x1x4x384xf32> to vector<4x384xf32>
    %c32 = arith.constant 32 : index
    %c0_38 = arith.constant 0 : index
    %29 = vector.load %arg6[%c32, %c0_38] : memref<36x384xf32, #tpu.memory_space<vmem>>, vector<4x384xf32>
    tpu.vector_store %arg6[%c32, %c0_38], %28 {strides = array<i32>} : memref<36x384xf32, #tpu.memory_space<vmem>>, vector<4x384xf32>,
    %c0_39 = arith.constant 0 : index
    %c0_40 = arith.constant 0 : index
    %30 = vector.load %arg2[%c0_39, %c0_40] : memref<8x36xf32, #tpu.memory_space<vmem>>, vector<8x36xf32>
    %c0_41 = arith.constant 0 : index
    %c0_42 = arith.constant 0 : index
    %31 = vector.load %arg6[%c0_41, %c0_42] : memref<36x384xf32, #tpu.memory_space<vmem>>, vector<36x384xf32>
    %cst = arith.constant dense<0.000000e+00> : vector<8x384xf32>
    %32 = tpu.matmul %30, %31, %cst {dimension_numbers = #tpu.dot_dimension_numbers<[1], [0], [0], [1], [0, 0, 1, 1], [], []>} : vector<8x36xf32>, vector<36x384xf32>, vector<8x384xf32> -> vector<8x384xf32>
    %c0_43 = arith.constant 0 : index
    %c0_44 = arith.constant 0 : index
    %33 = vector.load %arg3[%c0_43, %c0_44] : memref<1x384xf32, #tpu.memory_space<vmem>>, vector<1x384xf32>
    %34 = vector.broadcast %33 : vector<1x384xf32> to vector<8x384xf32>
    %35 = arith.mulf %32, %34 : vector<8x384xf32>
    %36 = arith.index_cast %arg0 : i32 to index
    %c0_45 = arith.constant 0 : index
    %c0_46 = arith.constant 0 : index
    %37 = vector.load %arg7[%36, %c0_45, %c0_46] : memref<2x8x384xf32, #tpu.memory_space<vmem>>, vector<1x8x384xf32>
    %38 = vector.shape_cast %37 : vector<1x8x384xf32> to vector<8x384xf32>
    %39 = vector.shape_cast %35 : vector<8x384xf32> to vector<1x8x384xf32>
    tpu.vector_store %arg7[%36, %c0_45, %c0_46], %39 {strides = array<i32>} : memref<2x8x384xf32, #tpu.memory_space<vmem>>, vector<1x8x384xf32>,
    %40 = math.absf %35 : vector<8x384xf32>
    %cst_47 = arith.constant dense<0xFF800000> : vector<8xf32>
    %41 = vector.multi_reduction <maximumf>, %40, %cst_47 [1] : vector<8x384xf32> to vector<8xf32>
    %42 = vector.shape_cast %41 : vector<8xf32> to vector<8x1xf32>
    %cst_48 = arith.constant dense<0xFF800000> : vector<1xf32>
    %43 = vector.multi_reduction <maximumf>, %42, %cst_48 [0] : vector<8x1xf32> to vector<1xf32>
    %44 = vector.shape_cast %43 : vector<1xf32> to vector<1x1xf32>
    %c0_49 = arith.constant 0 : index
    %c0_50 = arith.constant 0 : index
    %45 = vector.load %arg8[%c0_49, %c0_50] : memref<1x1xf32, #tpu.memory_space<vmem>>, vector<1x1xf32>
    %46 = arith.maximumf %45, %44 : vector<1x1xf32>
    %c0_51 = arith.constant 0 : index
    %c0_52 = arith.constant 0 : index
    %47 = vector.load %arg8[%c0_51, %c0_52] : memref<1x1xf32, #tpu.memory_space<vmem>>, vector<1x1xf32>
    tpu.vector_store %arg8[%c0_51, %c0_52], %46 {strides = array<i32>} : memref<1x1xf32, #tpu.memory_space<vmem>>, vector<1x1xf32>,
    %c1_i32 = arith.constant 1 : i32
    %48 = arith.cmpi eq, %arg0, %c1_i32 : i32
    %49 = arith.extui %48 : i1 to i32
    %c0_i32_53 = arith.constant 0 : i32
    %50 = arith.cmpi ne, %49, %c0_i32_53 : i32
    scf.if %50 {
      %c0_54 = arith.constant 0 : index
      %c0_55 = arith.constant 0 : index
      %51 = vector.load %arg8[%c0_54, %c0_55] : memref<1x1xf32, #tpu.memory_space<vmem>>, vector<1x1xf32>
      %cst_56 = arith.constant 3.05180438E-5 : f32
      %52 = vector.broadcast %cst_56 : f32 to vector<1x1xf32>
      %53 = arith.mulf %51, %52 : vector<1x1xf32>
      %cst_57 = arith.constant 7.88860905E-31 : f32
      %54 = vector.broadcast %cst_57 : f32 to vector<1x1xf32>
      %55 = arith.maximumf %53, %54 : vector<1x1xf32>
      %56 = math.log %55 : vector<1x1xf32>
      %cst_58 = arith.constant 2.000000e+00 : f32
      %57 = math.log %cst_58 : f32
      %58 = vector.broadcast %57 : f32 to vector<1x1xf32>
      %59 = arith.divf %56, %58 : vector<1x1xf32>
      %60 = math.ceil %59 : vector<1x1xf32>
      %61 = math.exp2 %60 : vector<1x1xf32>
      %cst_59 = arith.constant 1.000000e+00 : f32
      %62 = vector.broadcast %cst_59 : f32 to vector<1x1xf32>
      %63 = arith.divf %62, %61 : vector<1x1xf32>
      %c0_60 = arith.constant 0 : index
      %c0_61 = arith.constant 0 : index
      %c0_62 = arith.constant 0 : index
      %64 = vector.load %arg7[%c0_60, %c0_61, %c0_62] : memref<2x8x384xf32, #tpu.memory_space<vmem>>, vector<1x8x384xf32>
      %65 = vector.shape_cast %64 : vector<1x8x384xf32> to vector<8x384xf32>
      %66 = vector.broadcast %63 : vector<1x1xf32> to vector<8x384xf32>
      %67 = arith.mulf %65, %66 : vector<8x384xf32>
      %68 = math.roundeven %67 : vector<8x384xf32>
      %c-32768_i32 = arith.constant -32768 : i32
      %c32767_i32 = arith.constant 32767 : i32
      %69 = arith.sitofp %c-32768_i32 : i32 to f32
      %70 = vector.broadcast %69 : f32 to vector<8x384xf32>
      %71 = arith.maximumf %70, %68 : vector<8x384xf32>
      %72 = arith.sitofp %c32767_i32 : i32 to f32
      %73 = vector.broadcast %72 : f32 to vector<8x384xf32>
      %74 = arith.minimumf %73, %71 : vector<8x384xf32>
      %75 = vector.broadcast %61 : vector<1x1xf32> to vector<8x384xf32>
      %76 = arith.mulf %74, %75 : vector<8x384xf32>
      %c0_63 = arith.constant 0 : index
      %c0_64 = arith.constant 0 : index
      %77 = vector.load %arg4[%c0_63, %c0_64] : memref<8x1xf32, #tpu.memory_space<vmem>>, vector<8x1xf32>
      %78 = vector.broadcast %77 : vector<8x1xf32> to vector<8x384xf32>
      %79 = arith.addf %76, %78 : vector<8x384xf32>
      %80 = math.roundeven %79 : vector<8x384xf32>
      %c-128_i32 = arith.constant -128 : i32
      %c127_i32 = arith.constant 127 : i32
      %81 = arith.sitofp %c-128_i32 : i32 to f32
      %82 = vector.broadcast %81 : f32 to vector<8x384xf32>
      %83 = arith.maximumf %82, %80 : vector<8x384xf32>
      %84 = arith.sitofp %c127_i32 : i32 to f32
      %85 = vector.broadcast %84 : f32 to vector<8x384xf32>
      %86 = arith.minimumf %85, %83 : vector<8x384xf32>
      %c0_65 = arith.constant 0 : index
      %c0_66 = arith.constant 0 : index
      %c0_67 = arith.constant 0 : index
      %87 = vector.load %arg5[%c0_65, %c0_66, %c0_67] : memref<2x8x384xf32, #tpu.memory_space<vmem>>, vector<1x8x384xf32>
      %88 = vector.shape_cast %87 : vector<1x8x384xf32> to vector<8x384xf32>
      %89 = vector.shape_cast %86 : vector<8x384xf32> to vector<1x8x384xf32>
      tpu.vector_store %arg5[%c0_65, %c0_66, %c0_67], %89 {strides = array<i32>} : memref<2x8x384xf32, #tpu.memory_space<vmem>>, vector<1x8x384xf32>,
      %c1_68 = arith.constant 1 : index
      %c0_69 = arith.constant 0 : index
      %c0_70 = arith.constant 0 : index
      %90 = vector.load %arg7[%c1_68, %c0_69, %c0_70] : memref<2x8x384xf32, #tpu.memory_space<vmem>>, vector<1x8x384xf32>
      %91 = vector.shape_cast %90 : vector<1x8x384xf32> to vector<8x384xf32>
      %92 = vector.broadcast %63 : vector<1x1xf32> to vector<8x384xf32>
      %93 = arith.mulf %91, %92 : vector<8x384xf32>
      %94 = math.roundeven %93 : vector<8x384xf32>
      %c-32768_i32_71 = arith.constant -32768 : i32
      %c32767_i32_72 = arith.constant 32767 : i32
      %95 = arith.sitofp %c-32768_i32_71 : i32 to f32
      %96 = vector.broadcast %95 : f32 to vector<8x384xf32>
      %97 = arith.maximumf %96, %94 : vector<8x384xf32>
      %98 = arith.sitofp %c32767_i32_72 : i32 to f32
      %99 = vector.broadcast %98 : f32 to vector<8x384xf32>
      %100 = arith.minimumf %99, %97 : vector<8x384xf32>
      %101 = vector.broadcast %61 : vector<1x1xf32> to vector<8x384xf32>
      %102 = arith.mulf %100, %101 : vector<8x384xf32>
      %c0_73 = arith.constant 0 : index
      %c0_74 = arith.constant 0 : index
      %103 = vector.load %arg4[%c0_73, %c0_74] : memref<8x1xf32, #tpu.memory_space<vmem>>, vector<8x1xf32>
      %104 = vector.broadcast %103 : vector<8x1xf32> to vector<8x384xf32>
      %105 = arith.addf %102, %104 : vector<8x384xf32>
      %106 = math.roundeven %105 : vector<8x384xf32>
      %c-128_i32_75 = arith.constant -128 : i32
      %c127_i32_76 = arith.constant 127 : i32
      %107 = arith.sitofp %c-128_i32_75 : i32 to f32
      %108 = vector.broadcast %107 : f32 to vector<8x384xf32>
      %109 = arith.maximumf %108, %106 : vector<8x384xf32>
      %110 = arith.sitofp %c127_i32_76 : i32 to f32
      %111 = vector.broadcast %110 : f32 to vector<8x384xf32>
      %112 = arith.minimumf %111, %109 : vector<8x384xf32>
      %c1_77 = arith.constant 1 : index
      %c0_78 = arith.constant 0 : index
      %c0_79 = arith.constant 0 : index
      %113 = vector.load %arg5[%c1_77, %c0_78, %c0_79] : memref<2x8x384xf32, #tpu.memory_space<vmem>>, vector<1x8x384xf32>
      %114 = vector.shape_cast %113 : vector<1x8x384xf32> to vector<8x384xf32>
      %115 = vector.shape_cast %112 : vector<8x384xf32> to vector<1x8x384xf32>
      tpu.vector_store %arg5[%c1_77, %c0_78, %c0_79], %115 {strides = array<i32>} : memref<2x8x384xf32, #tpu.memory_space<vmem>>, vector<1x8x384xf32>,
    } else {
    }
    return
  }
  func.func @transform_0(%arg0: i32) -> (i32, i32, i32, i32) {
    %c0_i32 = arith.constant 0 : i32
    %c0_i32_0 = arith.constant 0 : i32
    %c0_i32_1 = arith.constant 0 : i32
    %c0_i32_2 = arith.constant 0 : i32
    return %arg0, %c0_i32, %c0_i32_0, %c0_i32_1 : i32, i32, i32, i32
  }
  func.func @transform_1(%arg0: i32) -> (i32, i32) {
    %c0_i32 = arith.constant 0 : i32
    %c0_i32_0 = arith.constant 0 : i32
    %c0_i32_1 = arith.constant 0 : i32
    return %c0_i32, %c0_i32_0 : i32, i32
  }
  func.func @transform_2(%arg0: i32) -> (i32, i32) {
    %c0_i32 = arith.constant 0 : i32
    %c0_i32_0 = arith.constant 0 : i32
    %c0_i32_1 = arith.constant 0 : i32
    return %c0_i32, %c0_i32_0 : i32, i32
  }
  func.func @transform_3(%arg0: i32) -> (i32, i32) {
    %c0_i32 = arith.constant 0 : i32
    %c0_i32_0 = arith.constant 0 : i32
    %c0_i32_1 = arith.constant 0 : i32
    return %c0_i32, %c0_i32_0 : i32, i32
  }
  func.func @transform_4(%arg0: i32) -> (i32, i32, i32) {
    %c0_i32 = arith.constant 0 : i32
    %c0_i32_0 = arith.constant 0 : i32
    %c0_i32_1 = arith.constant 0 : i32
    %c0_i32_2 = arith.constant 0 : i32
    return %c0_i32, %c0_i32_0, %c0_i32_1 : i32, i32, i32
  }
}

</mosaic_0001>

<bundles_post_ra>
// kernel: basic_conv2d_quant.1
= control target key start
LH: loop header
LB: loop body
LE: loop exit
PB: predicated region body
PF: predicated region fallthrough
CT: control target
= control target key end

     0   :  { %s912_s15 = smov 0   ;;  %s1070_s0 = inlined_call_operand.vmem [shape: f32[2,1,4,422], index: 0, kind: input, shape index: {}]   ;;  %s1071_s1 = inlined_call_operand.vmem [shape: f32[8,36], index: 1, kind: input, shape index: {}]   ;;  %s1072_s2 = inlined_call_operand.vmem [shape: f32[1,384], index: 2, kind: input, shape index: {}]   ;;  %s1073_s3 = inlined_call_operand.vmem [shape: f32[8,1], index: 3, kind: input, shape index: {}]   ;;  %s1074_s4 = inlined_call_operand.vmem [shape: f32[2,8,384], index: 4, kind: output, shape index: {}]  }
   0x1 LB: > { %s918_s16 = sadd.s32 4294967295, %s874_s15   ;;  %p724_p0 = scmp.ge.s32.totalorder %s874_s15, 1  ;;  %s874_s15 = sphi %s912_s15, %s14_s15  }
   0x2   : > { %p157_p1 = scmp.lt.s32.totalorder %s874_s15, 3 }
   0x4   : > { %p158_p2 = pnand %p724_p0, %p157_p1 }
   0x5   : > { %p178_p3 = scmp.lt.s32.totalorder (!%p158_p2), %s918_s16, 1  ;;  %p727_p4 = scmp.ne.s32.totalorder (!%p158_p2), %s918_s16, 0 }
   0x6   : > { %161 = sbr.rel (%p158_p2) target bundleno = 731 (0x2db), region = 36 }
   0xb   : > { %s179_s17 = scalar_select %p178_p3, %s918_s16, 1 }
   0xc   : > { %186 = sbr.rel (%p727_p4) target bundleno = 19 (0x13), region = 40 }
   0xd   : > { %s741_s18 = sshll.u32 %s179_s17, 4 }
   0xe   : > { %s182_s21 = scalar_lea.vmem %s1070_s0, %s741_s18 }
  0x11   : > { %vm187_vm0 = vcmask 0   ;;  %v876_v0 = vmov 0.0  }
  0x12   : > { %188 = vst.msk [vmem:[#allocation4] sm:$0x1] %vm187_vm0, %v876_v0 }
  0x13 PF: > { %v190_v1 = vld [vmem:[%s182_s21 + $0x8] sm:$0xf]  ;;  %v928_v2 = vld [vmem:[%s182_s21] sm:$0xff]  ;;  %s877_s22 = smov 127   ;;  %s878_s23 = smov 126   ;;  %vm225_vm1 = vcmask 1039360  }
  0x14   : > { %195 = vst [vmem:[#allocation1 + $0x10] ss:$2 sm:$0xff] %v190_v1  ;;  %v931_v3 = vld [vmem:[%s182_s21 + $0x8] sm:$0xff]  ;;  %s879_s24 = smov 110   ;;  %s880_s25 = smov 109   ;;  %vm254_vm2 = vcmask 1031168  }
  0x15   : > { %193 = vst [vmem:[#allocation1] ss:$2 sm:$0xff] %v928_v2  ;;  %s881_s26 = smov 108   ;;  %s882_s27 = smov 92   ;;  %vm284_vm3 = vcmask 900096   ;;  %vm313_vm4 = vcmask 891904  }
  0x16   : > { %s883_s28 = smov 91   ;;  %s884_s29 = smov 90   ;;  %vm343_vm5 = vcmask 883712   ;;  %vm402_vm6 = vcmask 744448   ;;  %vm372_vm7 = vcmask 752640   ;;  %vm431_vm8 = vcmask 736256  }
  0x17   : > { %vm461_vm9 = vcmask 1043456   ;;  %vm457_vm10 = vcmask 293888   ;;  %s742_s8 = smul.u32 24, %s918_s16  ;;  %vm563_vm11 = vcmask 0   ;;  %p735_p5 = scmp.ne.s32.totalorder %s918_s16, 1 }
  0x19   : > { %s544_s9 = scalar_lea.vmem [#allocation3], %s742_s8 }
  0x1b   : > { %v198_v4 = vld.sshfl [vmem:[#allocation1 + $0x10] sm:$0xff pattern:$0x75316420] }
  0x1c   : > { %212 = vst [vmem:[#allocation1 + $0x11] ss:$2 sm:$0xff] %v931_v3  ;;  %v196_v5 = vld.sshfl [vmem:[#allocation1] sm:$0xff pattern:$0x75316420] }
  0x1d   : > { %204 = vst [vmem:[#allocation2 + $0x58] sm:$0xf] %v198_v4  ;;  %v197_v6 = vld.sshfl [vmem:[#allocation1 + $0x8] sm:$0xff pattern:$0x75316420] }
  0x1e   : > { %210 = vst [vmem:[#allocation1 + $0x1] ss:$2 sm:$0xff] %v928_v2 }
  0x1f   : > { %202 = vst [vmem:[#allocation2 + $0x30] sm:$0xf] %v196_v5 }
  0x20   : > { %203 = vst [vmem:[#allocation2] sm:$0xf] %v197_v6 }
  0x23   : > { %v216_v7 = vld.sshfl [vmem:[#allocation1 + $0x18] sm:$0xff pattern:$0x75316420]  ;;  %v215_v8 = vld.sshfl [vmem:[#allocation1 + $0x10] sm:$0xff pattern:$0x75316420] }
  0x24   : > { %223 = vrot.lane.b32.xlu0 %v216_v7, %s877_s22  ;;  %221 = vrot.lane.b32.xlu2 %v215_v8, %s877_s22  ;;  %241 = vst [vmem:[#allocation1 + $0x10] ss:$2 sm:$0xff] %v931_v3 }
  0x25   : > { %v938_v9 = vld.sshfl [vmem:[#allocation1] sm:$0xff pattern:$0x75316420]  ;;  %v940_v10 = vld.sshfl [vmem:[#allocation1 + $0x8] sm:$0xff pattern:$0x75316420] }
  0x26   : > { %239 = vst [vmem:[#allocation1] ss:$2 sm:$0xff] %v928_v2 }
  0x2b   : > { %v244_v11 = vld.sshfl [vmem:[#allocation1 + $0x10] sm:$0xff pattern:$0x75316420]  ;;  %v245_v12 = vld.sshfl [vmem:[#allocation1 + $0x18] sm:$0xff pattern:$0x75316420] }
  0x2c   : > { %250 = vrot.lane.b32.xlu0 %v244_v11, %s878_s23  ;;  %252 = vrot.lane.b32.xlu1 %v245_v12, %s878_s23  ;;  %271 = vst [vmem:[#allocation1 + $0x11] ss:$2 sm:$0xff] %v931_v3 }
  0x2d   : > { %v242_v13 = vld.sshfl [vmem:[#allocation1] sm:$0xff pattern:$0x75316420]  ;;  %v243_v14 = vld.sshfl [vmem:[#allocation1 + $0x8] sm:$0xff pattern:$0x75316420] }
  0x2e   : > { %246 = vrot.lane.b32.xlu2 %v242_v13, %s878_s23  ;;  %269 = vst [vmem:[#allocation1 + $0x1] ss:$2 sm:$0xff] %v928_v2 }
  0x33   : > { %v275_v15 = vld.sshfl [vmem:[#allocation1 + $0x18] sm:$0xff pattern:$0x75316420]  ;;  %v274_v16 = vld.sshfl [vmem:[#allocation1 + $0x10] sm:$0xff pattern:$0x75316420] }
  0x34   : > { %282 = vrot.lane.b32.xlu0 %v275_v15, %s879_s24  ;;  %300 = vst [vmem:[#allocation1 + $0x10] ss:$2 sm:$0xff] %v931_v3 }
  0x35   : > { %v272_v17 = vld.sshfl [vmem:[#allocation1] sm:$0xff pattern:$0x75316420]  ;;  %v273_v18 = vld.sshfl [vmem:[#allocation1 + $0x8] sm:$0xff pattern:$0x75316420] }
  0x36   : > { %298 = vst [vmem:[#allocation1] ss:$2 sm:$0xff] %v928_v2  ;;  %280 = vrot.lane.b32.xlu2 %v274_v16, %s879_s24 }
  0x3b   : > { %v304_v19 = vld.sshfl [vmem:[#allocation1 + $0x18] sm:$0xff pattern:$0x75316420]  ;;  %v303_v20 = vld.sshfl [vmem:[#allocation1 + $0x10] sm:$0xff pattern:$0x75316420] }
  0x3c   : > { %311 = vrot.lane.b32.xlu1 %v304_v19, %s880_s25  ;;  %309 = vrot.lane.b32.xlu0 %v303_v20, %s880_s25  ;;  %330 = vst [vmem:[#allocation1 + $0x11] ss:$2 sm:$0xff] %v931_v3 }
  0x3d   : > { %v302_v21 = vld.sshfl [vmem:[#allocation1 + $0x8] sm:$0xff pattern:$0x75316420]  ;;  %v301_v22 = vld.sshfl [vmem:[#allocation1] sm:$0xff pattern:$0x75316420] }
  0x3e   : > { %307 = vrot.lane.b32.xlu2 %v302_v21, %s880_s25  ;;  %328 = vst [vmem:[#allocation1 + $0x1] ss:$2 sm:$0xff] %v928_v2 }
  0x43   : > { %v334_v23 = vld.sshfl [vmem:[#allocation1 + $0x18] sm:$0xff pattern:$0x75316420]  ;;  %v333_v24 = vld.sshfl [vmem:[#allocation1 + $0x10] sm:$0xff pattern:$0x75316420] }
  0x44   : > { %341 = vrot.lane.b32.xlu0 %v334_v23, %s881_s26  ;;  %305 = vrot.lane.b32.xlu1 %v301_v22, %s880_s25  ;;  %359 = vst [vmem:[#allocation1 + $0x10] ss:$2 sm:$0xff] %v931_v3 }
  0x45   : > { %v332_v25 = vld.sshfl [vmem:[#allocation1 + $0x8] sm:$0xff pattern:$0x75316420]  ;;  %v331_v26 = vld.sshfl [vmem:[#allocation1] sm:$0xff pattern:$0x75316420] }
  0x46   : > { %339 = vrot.lane.b32.xlu2 %v333_v24, %s881_s26  ;;  %357 = vst [vmem:[#allocation1] ss:$2 sm:$0xff] %v928_v2 }
  0x4b   : > { %v362_v27 = vld.sshfl [vmem:[#allocation1 + $0x10] sm:$0xff pattern:$0x75316420]  ;;  %v363_v28 = vld.sshfl [vmem:[#allocation1 + $0x18] sm:$0xff pattern:$0x75316420] }
  0x4c   : > { %337 = vrot.lane.b32.xlu1 %v332_v25, %s881_s26  ;;  %335 = vrot.lane.b32.xlu0 %v331_v26, %s881_s26  ;;  %389 = vst [vmem:[#allocation1 + $0x11] ss:$2 sm:$0xff] %v931_v3 }
  0x4d   : > { %v361_v29 = vld.sshfl [vmem:[#allocation1 + $0x8] sm:$0xff pattern:$0x75316420]  ;;  %v360_v30 = vld.sshfl [vmem:[#allocation1] sm:$0xff pattern:$0x75316420] }
  0x4e   : > { %366 = vrot.lane.b32.xlu2 %v361_v29, %s882_s27  ;;  %387 = vst [vmem:[#allocation1 + $0x1] ss:$2 sm:$0xff] %v928_v2 }
  0x53   : > { %v392_v31 = vld.sshfl [vmem:[#allocation1 + $0x10] sm:$0xff pattern:$0x75316420]  ;;  %v393_v32 = vld.sshfl [vmem:[#allocation1 + $0x18] sm:$0xff pattern:$0x75316420] }
  0x54   : > { %368 = vrot.lane.b32.xlu1 %v362_v27, %s882_s27  ;;  %418 = vst [vmem:[#allocation1 + $0x10] ss:$2 sm:$0xff] %v931_v3 }
  0x55   : > { %v390_v33 = vld.sshfl [vmem:[#allocation1] sm:$0xff pattern:$0x75316420]  ;;  %v391_v34 = vld.sshfl [vmem:[#allocation1 + $0x8] sm:$0xff pattern:$0x75316420] }
  0x56   : > { %398 = vrot.lane.b32.xlu2 %v392_v31, %s883_s28  ;;  %394 = vrot.lane.b32.xlu0 %v390_v33, %s883_s28  ;;  %416 = vst [vmem:[#allocation1] ss:$2 sm:$0xff] %v928_v2  ;;  %v441_v31 = vld [vmem:[%s1071_s1] sm:$0xff] }
  0x5b   : > { %v421_v35 = vld.sshfl [vmem:[#allocation1 + $0x10] sm:$0xff pattern:$0x75316420]  ;;  %v422_v36 = vld.sshfl [vmem:[#allocation1 + $0x18] sm:$0xff pattern:$0x75316420] }
  0x5c   : > { %370 = vrot.lane.b32.xlu1 %v363_v28, %s882_s27 }
  0x5d   : > { %v420_v37 = vld.sshfl [vmem:[#allocation1 + $0x8] sm:$0xff pattern:$0x75316420]  ;;  %v419_v38 = vld.sshfl [vmem:[#allocation1] sm:$0xff pattern:$0x75316420] }
  0x5e   : > { %400 = vrot.lane.b32.xlu2 %v393_v32, %s883_s28  ;;  %427 = vrot.lane.b32.xlu0 %v421_v35, %s884_s29 }
  0x64   : > { %364 = vrot.lane.b32.xlu1 %v360_v30, %s882_s27 }
  0x66   : > { %429 = vrot.lane.b32.xlu0 %v422_v36, %s884_s29  ;;  %425 = vrot.lane.b32.xlu2 %v420_v37, %s884_s29 }
  0x6c   : > { %396 = vrot.lane.b32.xlu1 %v391_v34, %s883_s28 }
  0x6e   : > { %248 = vrot.lane.b32.xlu0 %v243_v14, %s878_s23  ;;  %278 = vrot.lane.b32.xlu2 %v273_v18, %s879_s24 }
  0x74   : > { %276 = vrot.lane.b32.xlu1 %v272_v17, %s879_s24 }
  0x76   : > { %217 = vrot.lane.b32.xlu0 %v938_v9, %s877_s22 }
  0x7c   : > { %423 = vrot.lane.b32.xlu1 %v419_v38, %s884_s29 }
  0x7e   : > { %v965_v39 = vpop.permute.xlu2 %221 }
  0x84   : > { %219 = vrot.lane.b32.xlu1 %v940_v10, %s877_s22 }
  0x88   : > { %v969_v40 = vpop.permute.xlu2 %246 }
  0x90   : > { %v281_v41 = vpop.permute.xlu2 %280 }
  0x96   : > { %v224_v42 = vpop.permute.xlu0 %223 }
  0x97   : > { %v228_v43 = vsel %vm225_vm1, %v965_v39, %v224_v42 }
  0x98   : > { %234 = vst [vmem:[#allocation2 + $0x58] sm:$0xf0] %v228_v43  ;;  %v308_v44 = vpop.permute.xlu2 %307 }
  0x9e   : > { %v973_v45 = vpop.permute.xlu0 %250  ;;  %v253_v46 = vpop.permute.xlu1 %252 }
  0x9f   : > { %v257_v47 = vsel %vm254_vm2, %v973_v45, %v253_v46  ;;  %v444_v32 = vld [vmem:[#allocation2 + $0x58] sm:$0xff] }
  0xa0   : > { %v340_v48 = vpop.permute.xlu2 %339  ;;  %263 = vst [vmem:[#allocation2 + $0x68] sm:$0xf] %v257_v47 }
  0xa6   : > { %v283_v49 = vpop.permute.xlu0 %282 }
  0xa7   : > { %v287_v50 = vsel %vm284_vm3, %v281_v41, %v283_v49 }
  0xa8   : > { %293 = vst [vmem:[#allocation2 + $0x68] sm:$0xf0] %v287_v50  ;;  %v367_v51 = vpop.permute.xlu2 %366 }
  0xae   : > { %v312_v52 = vpop.permute.xlu1 %311  ;;  %v310_v53 = vpop.permute.xlu0 %309 }
  0xaf   : > { %v315_v54 = vsel %vm313_vm4, %v308_v44, %v310_v53  ;;  %v316_v55 = vsel %vm313_vm4, %v310_v53, %v312_v52  ;;  %v447_v29 = vld [vmem:[#allocation2 + $0x68] sm:$0xff] }
  0xb0   : > { %321 = vst [vmem:[#allocation2 + $0x48] sm:$0xf] %v315_v54  ;;  %v399_v56 = vpop.permute.xlu2 %398 }
  0xb1   : > { %322 = vst [vmem:[#allocation2 + $0x40] sm:$0xf] %v316_v55 }
  0xb6   : > { %v342_v57 = vpop.permute.xlu0 %341  ;;  %v306_v58 = vpop.permute.xlu1 %305 }
  0xb7   : > { %v346_v59 = vsel %vm343_vm5, %v340_v48, %v342_v57  ;;  %v314_v60 = vsel %vm313_vm4, %v306_v58, %v308_v44 }
  0xb8   : > { %352 = vst [vmem:[#allocation2 + $0x40] sm:$0xf0] %v346_v59  ;;  %v401_v61 = vpop.permute.xlu2 %400 }
  0xb9   : > { %320 = vst [vmem:[#allocation2 + $0x8] sm:$0xf] %v314_v60  ;;  %v405_v62 = vsel %vm402_vm6, %v399_v56, %v401_v61 }
  0xba   : > { %411 = vst [vmem:[#allocation2 + $0x38] sm:$0xf0] %v405_v62 }
  0xbe   : > { %v338_v63 = vpop.permute.xlu1 %337  ;;  %v336_v0 = vpop.permute.xlu0 %335 }
  0xbf   : > { %v345_v1 = vsel %vm343_vm5, %v338_v63, %v340_v48  ;;  %v344_v2 = vsel %vm343_vm5, %v336_v0, %v338_v63  ;;  %v450_v26 = vld [vmem:[#allocation2 + $0x40] sm:$0xff] }
  0xc0   : > { %351 = vst [vmem:[#allocation2 + $0x48] sm:$0xf0] %v345_v1  ;;  %v426_v3 = vpop.permute.xlu2 %425 }
  0xc1   : > { %350 = vst [vmem:[#allocation2 + $0x8] sm:$0xf0] %v344_v2 }
  0xc6   : > { %v369_v4 = vpop.permute.xlu1 %368 }
  0xc7   : > { %v374_v5 = vsel %vm372_vm7, %v367_v51, %v369_v4  ;;  %v449_v33 = vld [vmem:[#allocation2 + $0x48] sm:$0xff] }
  0xc8   : > { %380 = vst [vmem:[#allocation2 + $0x10] sm:$0xf] %v374_v5  ;;  %v395_v6 = vpop.permute.xlu0 %394  ;;  %v279_v7 = vpop.permute.xlu2 %278  ;;  %v448_v44 = vld [vmem:[#allocation2 + $0x8] sm:$0xff] }
  0xc9   : > { %v286_v8 = vsel %vm284_vm3, %v279_v7, %v281_v41 }
  0xca   : > { %292 = vst [vmem:[#allocation2 + $0x50] sm:$0xf0] %v286_v8 }
  0xce   : > { %v371_v9 = vpop.permute.xlu1 %370 }
  0xcf   : > { %v375_v10 = vsel %vm372_vm7, %v369_v4, %v371_v9  ;;  %v561_v4 = vld [vmem:[#allocation4] sm:$0x1] }
  0xd0   : > { %381 = vst [vmem:[#allocation2 + $0x38] sm:$0xf] %v375_v10  ;;  %v428_v11 = vpop.permute.xlu0 %427 }
  0xd1   : > { %v433_v12 = vsel %vm431_vm8, %v426_v3, %v428_v11 }
  0xd2   : > { %439 = vst [vmem:[#allocation2 + $0x70] sm:$0xf] %v433_v12 }
  0xd6   : > { %v365_v13 = vpop.permute.xlu1 %364 }
  0xd7   : > { %v373_v14 = vsel %vm372_vm7, %v365_v13, %v367_v51  ;;  %v453_v25 = vld [vmem:[#allocation2 + $0x38] sm:$0xff] }
  0xd8   : > { %379 = vst [vmem:[#allocation2 + $0x20] sm:$0xf] %v373_v14  ;;  %v430_v15 = vpop.permute.xlu0 %429 }
  0xd9   : > { %v434_v16 = vsel %vm431_vm8, %v428_v11, %v430_v15  ;;  %v455_v17 = vld [vmem:[#allocation2 + $0x70] sm:$0xf] }
  0xda   : > { %440 = vst [vmem:[#allocation2 + $0x28] sm:$0xf] %v434_v16  ;;  %730 = vmatpush.msk.msra.mxu1 %vm461_vm9, %v455_v17 }
  0xde   : > { %v397_v18 = vpop.permute.xlu1 %396 }
  0xdf   : > { %v403_v19 = vsel %vm402_vm6, %v395_v6, %v397_v18  ;;  %v404_v20 = vsel %vm402_vm6, %v397_v18, %v399_v56 }
  0xe0   : > { %409 = vst [vmem:[#allocation2 + $0x20] sm:$0xf0] %v403_v19  ;;  %v249_v21 = vpop.permute.xlu0 %248 }
  0xe1   : > { %410 = vst [vmem:[#allocation2 + $0x10] sm:$0xf0] %v404_v20  ;;  %v255_v22 = vsel %vm254_vm2, %v969_v40, %v249_v21  ;;  %v256_v23 = vsel %vm254_vm2, %v249_v21, %v973_v45  ;;  %v456_v24 = vld [vmem:[#allocation2 + $0x28] sm:$0xf] }
  0xe2   : > { %261 = vst [vmem:[#allocation2 + $0x18] sm:$0xf] %v255_v22  ;;  %732 = vmatpush.msk.msra.mxu2 %vm461_vm9, %v456_v24 }
  0xe3   : > { %262 = vst [vmem:[#allocation2 + $0x50] sm:$0xf] %v256_v23 }
  0xe4   : > { %523 = vmatpush.msra.mxu2 %v453_v25 }
  0xe6   : > { %524 = vmatpush.msra.mxu2 %v450_v26  ;;  %v277_v27 = vpop.permute.xlu1 %276 }
  0xe7   : > { %v285_v28 = vsel %vm284_vm3, %v277_v27, %v279_v7  ;;  %v451_v43 = vld [vmem:[#allocation2 + $0x20] sm:$0xff] }
  0xe8   : > { %291 = vst [vmem:[#allocation2 + $0x18] sm:$0xf0] %v285_v28  ;;  %525 = vmatpush.msra.mxu2 %v447_v29  ;;  %v452_v30 = vld [vmem:[#allocation2 + $0x10] sm:$0xff]  ;;  %v218_v37 = vpop.permute.xlu0 %217 }
  0xe9   : > { %503 = vmatpush.msra.mxu1 %v452_v30 }
  0xea   : > { %526 = vmatpush.msra.mxu2 %v444_v32  ;;  %v446_v34 = vld [vmem:[#allocation2 + $0x50] sm:$0xff] }
  0xeb   : > { %504 = vmatpush.msra.mxu1 %v449_v33  ;;  %733 = vmatmul.msk.f32.vlgmr.msra.gmra.mxu2 %vm457_vm10, %v441_v31 }
  0xed   : > { %505 = vmatpush.msra.mxu1 %v446_v34 }
  0xee   : > { %v424_v35 = vpop.permute.xlu1 %423 }
  0xef   : > { %v432_v36 = vsel %vm431_vm8, %v424_v35, %v426_v3  ;;  %v445_v45 = vld [vmem:[#allocation2 + $0x18] sm:$0xff] }
  0xf0   : > { %438 = vst [vmem:[#allocation2 + $0x60] sm:$0xf] %v432_v36 }
  0xf6   : > { %v220_v38 = vpop.permute.xlu1 %219 }
  0xf7   : > { %v226_v40 = vsel %vm225_vm1, %v218_v37, %v220_v38  ;;  %v227_v41 = vsel %vm225_vm1, %v220_v38, %v965_v39  ;;  %v454_v42 = vld [vmem:[#allocation2 + $0x60] sm:$0xf]  ;;  %v531_v39 = vld [vmem:[%s1072_s2] sm:$0x7] }
  0xf8   : > { %232 = vst [vmem:[#allocation2 + $0x30] sm:$0xf0] %v226_v40  ;;  %728 = vmatpush.msk.msra.mxu0 %vm461_vm9, %v454_v42  ;;  %v535_v48 = vperm.slane %v531_v39, 2  ;;  %v533_v51 = vperm.slane %v531_v39, 0  ;;  %v534_v52 = vperm.slane %v531_v39, 1 }
  0xf9   : > { %233 = vst [vmem:[#allocation2] sm:$0xf0] %v227_v41 }
  0xfa   : > { %483 = vmatpush.msra.mxu0 %v451_v43 }
  0xfc   : > { %484 = vmatpush.msra.mxu0 %v448_v44 }
  0xfe   : > { %485 = vmatpush.msra.mxu0 %v445_v45 }
  0xff   : > { %v442_v46 = vld [vmem:[#allocation2 + $0x30] sm:$0xff] }
 0x100   : > { %486 = vmatpush.msra.mxu0 %v442_v46  ;;  %v443_v47 = vld [vmem:[#allocation2] sm:$0xff] }
 0x101   : > { %506 = vmatpush.msra.mxu1 %v443_v47  ;;  %729 = vmatmul.msk.f32.vlgmr.msra.gmra.mxu0 %vm457_vm10, %v441_v31 }
 0x102   : > { %731 = vmatmul.msk.f32.vlgmr.msra.gmra.mxu1 %vm457_vm10, %v441_v31 }
 0x16e   : > { %v528_v49 = vpop.f32.mrf.mxu2 }
 0x16f   : > { %v541_v50 = vmul.f32 %v535_v48, %v528_v49 }
 0x171   : > { %547 = vst [vmem:[%s544_s9 + $0x10] sm:$0xff] %v541_v50  ;;  %v550_v59 = vand.u32 2147483647, %v541_v50 }
 0x17e   : > { %v488_v53 = vpop.f32.mrf.mxu0 }
 0x17f   : > { %v539_v54 = vmul.f32 %v533_v51, %v488_v53  ;;  %v508_v55 = vpop.f32.mrf.mxu1 }
 0x180   : > { %v540_v56 = vmul.f32 %v534_v52, %v508_v55 }
 0x181   : > { %545 = vst [vmem:[%s544_s9] sm:$0xff] %v539_v54  ;;  %v548_v57 = vand.u32 2147483647, %v539_v54 }
 0x182   : > { %546 = vst [vmem:[%s544_s9 + $0x8] sm:$0xff] %v540_v56  ;;  %v549_v58 = vand.u32 2147483647, %v540_v56 }
 0x184   : > { %v551_v60 = vmax.f32 %v548_v57, %v549_v58 }
 0x186   : > { %v552_v61 = vmax.f32 %v551_v60, %v550_v59 }
 0x188   : > { %553 = vmax.xlane.f32.xlu2 %v552_v61 }
 0x1fb   : > { %v554_v62 = vpop.xlane.xlu2 %553 }
 0x1fc   : > { %v555_v63 = vrot.slane %v554_v62, 4 }
 0x1fe   : > { %v556_v0 = vmax.f32 %v554_v62, %v555_v63 }
 0x200   : > { %v557_v1 = vrot.slane %v556_v0, 2 }
 0x202   : > { %v558_v2 = vmax.f32 %v556_v0, %v557_v1 }
 0x204   : > { %v559_v3 = vrot.slane %v558_v2, 1 }
 0x206   : > { %v560_v5 = vmax.f32 %v558_v2, %v559_v3  ;;  %568 = sbr.rel (%p735_p5) target bundleno = 731 (0x2db), region = 44 }
 0x208   : > { %v562_v6 = vmax.f32 %v561_v4, %v560_v5 }
 0x20a   : > { %564 = vst.msk [vmem:[#allocation4] sm:$0x1] %vm563_vm11, %v562_v6 }
 0x20b   : > { %v885_v8 = vmov 0   ;;  %v886_v10 = vmov 0.6931472   ;;  %v629_v19 = vld [vmem:[%s1073_s3] sm:$0xff]  ;;  %v600_v37 = vld [vmem:[#allocation3 + $0x8] sm:$0xff]  ;;  %v601_v38 = vld [vmem:[#allocation3 + $0x10] sm:$0xff] }
 0x20c   : > { %858 = vset.pattern.permute.xlu0 %v885_v8  ;;  %859 = vset.pattern.permute.xlu1 %v885_v8  ;;  %860 = vrcp.f32 %v886_v10  ;;  %v599_v36 = vld [vmem:[#allocation3] sm:$0xff]  ;;  %v651_v40 = vld [vmem:[#allocation3 + $0x18] sm:$0xff]  ;;  %v653_v46 = vld [vmem:[#allocation3 + $0x28] sm:$0xff] }
 0x20d   : > { %632 = vperm.xlu1 %859, %v629_v19   ;;  %v652_v42 = vld [vmem:[#allocation3 + $0x20] sm:$0xff] }
 0x211   : > { %v569_v7 = vld [vmem:[#allocation4] sm:$0x1] }
 0x212   : > { %v570_v9 = vmul.f32 3.0518044e-05, %v569_v7  ;;  %v861_v12 = vpop.eup %860 }
 0x213   : > { %v575_v13 = vmul.f32 0.6931472, %v861_v12  ;;  %vm579_vm12 = vweird.f32 %v861_v12 }
 0x214   : > { %v571_v11 = vmax.f32 %v570_v9, 7.888609e-31 }
 0x215   : > { %v576_v14 = vsub.f32 1.0, %v575_v13  ;;  %672 = vperm.xlu1 %859, %v629_v19  }
 0x216   : > { %862 = vlog2.f32 %v571_v11 }
 0x217   : > { %v577_v16 = vmul.f32 %v861_v12, %v576_v14 }
 0x219   : > { %v578_v18 = vadd.f32 %v861_v12, %v577_v16 }
 0x21b   : > { %v580_v20 = vsel %vm579_vm12, %v861_v12, %v578_v18 }
 0x21c   : > { %v863_v15 = vpop.eup %862 }
 0x21d   : > { %v573_v17 = vmul.f32 0.6931472, %v863_v15 }
 0x21f   : > { %v581_v21 = vmul.f32 %v580_v20, %v573_v17 }
 0x221   : > { %v582_v22 = vceil.f32 %v581_v21 }
 0x223   : > { %864 = vpow2.f32 %v582_v22 }
 0x229   : > { %v865_v23 = vpop.eup %864 }
 0x22a   : > { %866 = vrcp.f32 %v865_v23  ;;  %v595_v26 = vand.u32 2147483648, %v865_v23  ;;  %vm589_vm13 = vweird.f32 %v865_v23  ;;  %v593_v28 = vand.u32 2147483647, %v865_v23 }
 0x22b   : > { %v621_v35 = vperm.slane %v865_v23, 0 }
 0x22c   : > { %v596_v30 = vor.u32 1.1754944e-38, %v595_v26  ;;  %vm594_vm0 = vcmp.eq.f32.partialorder %v593_v28, 8.507059e+37 }
 0x230   : > { %v867_v24 = vpop.eup %866 }
 0x231   : > { %v585_v25 = vmul.f32 %v867_v24, %v865_v23  ;;  %vm590_vm14 = vweird.f32 %v867_v24 }
 0x232   : > { %vm591_vm15 = vmor %vm589_vm13, %vm590_vm14 }
 0x233   : > { %v586_v27 = vsub.f32 1.0, %v585_v25 }
 0x235   : > { %v587_v29 = vmul.f32 %v867_v24, %v586_v27 }
 0x237   : > { %v588_v31 = vadd.f32 %v867_v24, %v587_v29 }
 0x239   : > { %v592_v32 = vsel %vm591_vm15, %v867_v24, %v588_v31 }
 0x23a   : > { %v597_v33 = vsel %vm594_vm0, %v596_v30, %v592_v32 }
 0x23b   : > { %v603_v34 = vperm.slane %v597_v33, 0 }
 0x23d   : > { %605 = vperm.xlu0 %858, %v603_v34  }
 0x245   : > { %623 = vperm.xlu0 %858, %v621_v35  }
 0x27f   : > { %v633_v30 = vpop.permute.xlu1 %632 }
 0x287   : > { %v673_v3 = vpop.permute.xlu1 %672 }
 0x2af   : > { %v606_v41 = vpop.permute.xlu0 %605 }
 0x2b0   : > { %v608_v43 = vmul.f32 %v606_v41, %v599_v36  ;;  %v609_v44 = vmul.f32 %v606_v41, %v600_v37  ;;  %v610_v45 = vmul.f32 %v606_v41, %v601_v38  ;;  %v654_v47 = vmul.f32 %v651_v40, %v606_v41 }
 0x2b1   : > { %v655_v50 = vmul.f32 %v652_v42, %v606_v41  ;;  %v1013_v54 = vmul.f32 %v653_v46, %v606_v41 }
 0x2b2   : > { %v743_v39 = vand.u32 2147483647, %v608_v43  ;;  %v745_v48 = vcvt.f32.s32 %v608_v43  ;;  %v751_v49 = vand.u32 2147483647, %v609_v44  ;;  %v753_v51 = vcvt.f32.s32 %v609_v44 }
 0x2b3   : > { %v759_v52 = vand.u32 2147483647, %v610_v45  ;;  %v761_v53 = vcvt.f32.s32 %v610_v45  ;;  %v748_v56 = vand.u32 2147483648, %v608_v43  ;;  %v756_v57 = vand.u32 2147483648, %v609_v44 }
 0x2b4   : > { %v746_v55 = vcvt.s32.f32 %v745_v48  ;;  %vm1015_vm1 = vcmp.lt.f32.partialorder %v743_v39, 8388608.0  ;;  %v754_v59 = vcvt.s32.f32 %v753_v51  ;;  %v791_v61 = vand.u32 2147483647, %v654_v47 }
 0x2b5   : > { %v762_v60 = vcvt.s32.f32 %v761_v53  ;;  %vm1019_vm2 = vcmp.lt.f32.partialorder %v751_v49, 8388608.0  ;;  %v764_v0 = vand.u32 2147483648, %v610_v45  ;;  %v793_v1 = vcvt.f32.s32 %v654_v47 }
 0x2b6   : > { %v747_v62 = vand.u32 2147483647, %v746_v55  ;;  %v755_v2 = vand.u32 2147483647, %v754_v59  ;;  %vm1023_vm3 = vcmp.lt.f32.partialorder %v759_v52, 8388608.0  ;;  %v801_v5 = vcvt.f32.s32 %v655_v50 }
 0x2b7   : > { %v763_v4 = vand.u32 2147483647, %v762_v60  ;;  %v794_v7 = vcvt.s32.f32 %v793_v1  ;;  %v796_v8 = vand.u32 2147483648, %v654_v47  ;;  %v799_v9 = vand.u32 2147483647, %v655_v50  ;;  %v624_v33 = vpop.permute.xlu0 %623 }
 0x2b8   : > { %v749_v6 = vor.u32 %v748_v56, %v747_v62  ;;  %v757_v10 = vor.u32 %v756_v57, %v755_v2  ;;  %vm1027_vm4 = vcmp.lt.f32.partialorder %v791_v61, 8388608.0  ;;  %v802_v13 = vcvt.s32.f32 %v801_v5 }
 0x2b9   : > { %v765_v11 = vor.u32 %v764_v0, %v763_v4  ;;  %v795_v15 = vand.u32 2147483647, %v794_v7  ;;  %v804_v16 = vand.u32 2147483648, %v655_v50  ;;  %v809_v17 = vcvt.f32.s32 %v1013_v54 }
 0x2ba   : > { %v750_v14 = vsel %vm1015_vm1, %v749_v6, %v608_v43  ;;  %v758_v18 = vsel %vm1019_vm2, %v757_v10, %v609_v44  ;;  %v803_v21 = vand.u32 2147483647, %v802_v13  ;;  %vm1038_vm5 = vcmp.lt.f32.partialorder %v799_v9, 8388608.0 }
 0x2bb   : > { %v766_v19 = vsel %vm1023_vm3, %v765_v11, %v610_v45  ;;  %v614_v20 = vmax.f32 %v750_v14, -32768.0  ;;  %v615_v22 = vmax.f32 %v758_v18, -32768.0  ;;  %v797_v24 = vor.u32 %v796_v8, %v795_v15 }
 0x2bc   : > { %v616_v23 = vmax.f32 %v766_v19, -32768.0  ;;  %v805_v27 = vor.u32 %v804_v16, %v803_v21  ;;  %v807_v28 = vand.u32 2147483647, %v1013_v54  ;;  %v810_v29 = vcvt.s32.f32 %v809_v17 }
 0x2bd   : > { %v617_v26 = vmin.f32 %v614_v20, 32767.0  ;;  %v618_v31 = vmin.f32 %v615_v22, 32767.0  ;;  %v798_v34 = vsel %vm1027_vm4, %v797_v24, %v654_v47  ;;  %v812_v35 = vand.u32 2147483648, %v1013_v54 }
 0x2be   : > { %v619_v32 = vmin.f32 %v616_v23, 32767.0  ;;  %v806_v37 = vsel %vm1038_vm5, %v805_v27, %v655_v50  ;;  %v811_v38 = vand.u32 2147483647, %v810_v29  ;;  %v660_v40 = vmax.f32 %v798_v34, -32768.0 }
 0x2bf   : > { %v626_v36 = vmul.f32 %v624_v33, %v617_v26  ;;  %v627_v41 = vmul.f32 %v624_v33, %v618_v31  ;;  %v661_v43 = vmax.f32 %v806_v37, -32768.0  ;;  %vm808_vm6 = vcmp.lt.f32.partialorder %v807_v28, 8388608.0 }
 0x2c0   : > { %v628_v42 = vmul.f32 %v624_v33, %v619_v32  ;;  %v813_v45 = vor.u32 %v812_v35, %v811_v38  ;;  %v663_v47 = vmin.f32 %v660_v40, 32767.0 }
 0x2c1   : > { %v635_v44 = vadd.f32 %v633_v30, %v626_v36  ;;  %v636_v46 = vadd.f32 %v633_v30, %v627_v41  ;;  %v664_v51 = vmin.f32 %v661_v43, 32767.0 }
 0x2c2   : > { %v637_v39 = vadd.f32 %v633_v30, %v628_v42  ;;  %v814_v49 = vsel %vm808_vm6, %v813_v45, %v1013_v54  ;;  %v666_v63 = vmul.f32 %v663_v47, %v624_v33 }
 0x2c3   : > { %v769_v48 = vcvt.f32.s32 %v635_v44  ;;  %v777_v52 = vcvt.f32.s32 %v636_v46  ;;  %v767_v53 = vand.u32 2147483647, %v635_v44  ;;  %v772_v56 = vand.u32 2147483648, %v635_v44 }
 0x2c4   : > { %v785_v50 = vcvt.f32.s32 %v637_v39  ;;  %v775_v57 = vand.u32 2147483647, %v636_v46  ;;  %v780_v59 = vand.u32 2147483648, %v636_v46  ;;  %v662_v60 = vmax.f32 %v814_v49, -32768.0 }
 0x2c5   : > { %v770_v55 = vcvt.s32.f32 %v769_v48  ;;  %v778_v58 = vcvt.s32.f32 %v777_v52  ;;  %v667_v0 = vmul.f32 %v664_v51, %v624_v33  ;;  %v783_v2 = vand.u32 2147483647, %v637_v39 }
 0x2c6   : > { %v786_v62 = vcvt.s32.f32 %v785_v50  ;;  %v665_v4 = vmin.f32 %v662_v60, 32767.0  ;;  %v788_v6 = vand.u32 2147483648, %v637_v39  ;;  %v675_v7 = vadd.f32 %v673_v3, %v666_v63 }
 0x2c7   : > { %v771_v61 = vand.u32 2147483647, %v770_v55  ;;  %v779_v1 = vand.u32 2147483647, %v778_v58  ;;  %vm768_vm7 = vcmp.lt.f32.partialorder %v767_v53, 8388608.0  ;;  %v676_v10 = vadd.f32 %v673_v3, %v667_v0 }
 0x2c8   : > { %v787_v5 = vand.u32 2147483647, %v786_v62  ;;  %v668_v9 = vmul.f32 %v665_v4, %v624_v33  ;;  %vm776_vm8 = vcmp.lt.f32.partialorder %v775_v57, 8388608.0  ;;  %v817_v13 = vcvt.f32.s32 %v675_v7 }
 0x2c9   : > { %v773_v54 = vor.u32 %v772_v56, %v771_v61  ;;  %v781_v8 = vor.u32 %v780_v59, %v779_v1  ;;  %vm784_vm9 = vcmp.lt.f32.partialorder %v783_v2, 8388608.0  ;;  %v815_v22 = vand.u32 2147483647, %v675_v7 }
 0x2ca   : > { %v789_v12 = vor.u32 %v788_v6, %v787_v5  ;;  %v677_v16 = vadd.f32 %v673_v3, %v668_v9  ;;  %v818_v19 = vcvt.s32.f32 %v817_v13  ;;  %v825_v23 = vcvt.f32.s32 %v676_v10 }
 0x2cb   : > { %v774_v11 = vsel %vm768_vm7, %v773_v54, %v635_v44  ;;  %v782_v14 = vsel %vm776_vm8, %v781_v8, %v636_v46  ;;  %v820_v26 = vand.u32 2147483648, %v675_v7  ;;  %v823_v31 = vand.u32 2147483647, %v676_v10 }
 0x2cc   : > { %v641_v15 = vmax.f32 %v774_v11, -128.0  ;;  %v790_v17 = vsel %vm784_vm9, %v789_v12, %v637_v39  ;;  %v642_v18 = vmax.f32 %v782_v14, -128.0  ;;  %v819_v25 = vand.u32 2147483647, %v818_v19 }
 0x2cd   : > { %v643_v20 = vmax.f32 %v790_v17, -128.0  ;;  %v826_v28 = vcvt.s32.f32 %v825_v23  ;;  %v833_v29 = vcvt.f32.s32 %v677_v16  ;;  %vm816_vm10 = vcmp.lt.f32.partialorder %v815_v22, 8388608.0 }
 0x2ce   : > { %v644_v21 = vmin.f32 %v641_v15, 127.0  ;;  %v645_v24 = vmin.f32 %v642_v18, 127.0  ;;  %v821_v30 = vor.u32 %v820_v26, %v819_v25  ;;  %v828_v33 = vand.u32 2147483648, %v676_v10 }
 0x2cf   : > { %v646_v27 = vmin.f32 %v643_v20, 127.0  ;;  %v827_v32 = vand.u32 2147483647, %v826_v28  ;;  %v834_v34 = vcvt.s32.f32 %v833_v29  ;;  %v831_v36 = vand.u32 2147483647, %v677_v16 }
 0x2d0   : > { %647 = vst [vmem:[%s1074_s4] sm:$0xff] %v644_v21  ;;  %v822_v35 = vsel %vm816_vm10, %v821_v30, %v675_v7  ;;  %v836_v40 = vand.u32 2147483648, %v677_v16  ;;  %vm824_vm11 = vcmp.lt.f32.partialorder %v823_v31, 8388608.0 }
 0x2d1   : > { %648 = vst [vmem:[%s1074_s4 + $0x8] sm:$0xff] %v645_v24  ;;  %v829_v37 = vor.u32 %v828_v33, %v827_v32  ;;  %v835_v38 = vand.u32 2147483647, %v834_v34  ;;  %v681_v41 = vmax.f32 %v822_v35, -128.0  ;;  %vm832_vm12 = vcmp.lt.f32.partialorder %v831_v36, 8388608.0 }
 0x2d2   : > { %649 = vst [vmem:[%s1074_s4 + $0x10] sm:$0xff] %v646_v27 }
 0x2d3   : > { %v830_v42 = vsel %vm824_vm11, %v829_v37, %v676_v10  ;;  %v837_v43 = vor.u32 %v836_v40, %v835_v38  ;;  %v684_v44 = vmin.f32 %v681_v41, 127.0 }
 0x2d4   : > { %v682_v45 = vmax.f32 %v830_v42, -128.0 }
 0x2d5   : > { %v838_v46 = vsel %vm832_vm12, %v837_v43, %v677_v16  ;;  %736 = vst [vmem:[%s1074_s4 + $0x18] sm:$0xff] %v684_v44 }
 0x2d6   : > { %v683_v39 = vmax.f32 %v838_v46, -128.0  ;;  %v685_v48 = vmin.f32 %v682_v45, 127.0 }
 0x2d8   : > { %v686_v49 = vmin.f32 %v683_v39, 127.0  ;;  %737 = vst [vmem:[%s1074_s4 + $0x20] sm:$0xff] %v685_v48 }
 0x2da   : > { %738 = vst [vmem:[%s1074_s4 + $0x28] sm:$0xff] %v686_v49 }
 0x2db PF: > { %s14_s15 = sadd.s32 1, %s874_s15  }
 0x2dc   : > { %p11_p6 = scmp.ge.s32.totalorder %s14_s15, 4  }
 0x2de   :  { %13 = sbr.rel (!%p11_p6) target bundleno = 1 (0x1), region = 86 }

</bundles_post_ra>
